<compile_context>
chip_gen: v6e
topology: v6e:2x2x1
jax: 0.10.0
libtpu: 0.0.40
codegen_flags: <defaults>
</compile_context>

<pallas_src>
import jax
import jax.numpy as jnp
from jax import lax
from jax.experimental import pallas as pl
from jax.experimental.pallas import tpu as pltpu

KSIZE = 3    # MaxPool2d(kernel_size=3)
STRIDE = 3   # PyTorch default: stride = kernel_size


def _maxpool3x3_kernel(x_ref, o_ref, rmax_ref, otile_ref):
    """One grid step.

    x_ref:     (c_blk, hin_blk, W)  input tile  (W on lanes)
    o_ref:     (c_blk, oh_blk, OW)  output tile (OW on lanes)
    rmax_ref:  (c_blk, oh_blk, W)   VMEM scratch: row-window maxima
    otile_ref: (c_blk, oh_blk, OW)  VMEM scratch: assembled output tile
    """
    _, oh_blk, ow_blk = o_ref.shape

    x = x_ref[...]                                   # one dense load of the tile

    # Stage 1: max over the 3-row window of every output row.  Each maximum
    # spans the full (c_blk, 1, W) slab, so W stays dense on the lane axis.
    for oh in range(oh_blk):
        h0 = STRIDE * oh
        rmax_ref[:, oh:oh + 1, :] = jnp.maximum(
            jnp.maximum(x[:, h0:h0 + 1, :], x[:, h0 + 1:h0 + 2, :]),
            x[:, h0 + 2:h0 + 3, :])

    rm = rmax_ref[...]                               # (c_blk, oh_blk, W)

    # Stage 2: max over the 3-column window of every output column.  Each
    # maximum spans the full (c_blk, oh_blk, 1) slab.
    for ow in range(ow_blk):
        w0 = STRIDE * ow
        otile_ref[:, :, ow:ow + 1] = jnp.maximum(
            jnp.maximum(rm[:, :, w0:w0 + 1], rm[:, :, w0 + 1:w0 + 2]),
            rm[:, :, w0 + 2:w0 + 3])

    # Single dense store of the whole output tile (no per-(oh, ow) masked
    # partial stores on the pipelined output path).
    o_ref[...] = otile_ref[...]


def maxpool2d_3x3(x_nchw):
    """MaxPool2d(kernel_size=3, stride=3, padding=0, ceil_mode=False) on NCHW."""
    N, C, H, W = x_nchw.shape
    OH = (H - KSIZE) // STRIDE + 1
    OW = (W - KSIZE) // STRIDE + 1
    if OH <= 0 or OW <= 0:
        return jnp.zeros((N, C, max(OH, 0), max(OW, 0)), dtype=x_nchw.dtype)

    NC = N * C
    x2 = x_nchw.reshape(NC, H, W)        # free: NCHW is already (NC, H, W) row-major

    itemsize = x_nchw.dtype.itemsize
    budget = 1 << 20                     # ~1 MiB input block: double-buffered it
                                         # fits default scoped VMEM on v5e/v6e/v7x
    img_bytes = H * W * itemsize

    if img_bytes <= budget and OH <= 64:
        # Whole (H, W) image per block; group several channel-images per block
        # so each grid step moves a decent amount of data.
        oh_blk, hin_blk = OH, H
        c_blk = int(max(1, min(NC, 16, budget // img_bytes)))
    else:
        # Tile the output rows (8-aligned so sublane tiling stays aligned);
        # one channel-image per block.
        c_blk = 1
        rows_budget = max(KSIZE, budget // (W * itemsize))
        oh_blk = max(8, min(64, (rows_budget // STRIDE) // 8 * 8))
        if oh_blk >= OH:
            oh_blk, hin_blk = OH, H
        else:
            hin_blk = STRIDE * oh_blk

    n_c = pl.cdiv(NC, c_blk)
    n_oh = pl.cdiv(OH, oh_blk)

    cost = pl.CostEstimate(
        flops=8 * NC * OH * OW,                                   # ~8 compares/output
        transcendentals=0,
        bytes_accessed=(NC * H * W + NC * OH * OW) * itemsize)

    out2 = pl.pallas_call(
        _maxpool3x3_kernel,
        out_shape=jax.ShapeDtypeStruct((NC, OH, OW), x_nchw.dtype),
        grid=(n_c, n_oh),
        in_specs=[pl.BlockSpec((c_blk, hin_blk, W), lambda i, j: (i, j, 0))],
        out_specs=pl.BlockSpec((c_blk, oh_blk, OW), lambda i, j: (i, j, 0)),
        scratch_shapes=[
            pltpu.VMEM((c_blk, oh_blk, W), x_nchw.dtype),
            pltpu.VMEM((c_blk, oh_blk, OW), x_nchw.dtype),
        ],
        compiler_params=pltpu.CompilerParams(
            dimension_semantics=("parallel", "parallel")),
        cost_estimate=cost,
    )(x2)

    return out2.reshape(N, C, OH, OW)


if __name__ == "__main__":
    key = jax.random.PRNGKey(0)
    # Module has no parameters; only the pooling op.  NCHW input.
    x = jax.random.normal(key, (2, 4, 16, 16), dtype=jnp.float32)

    out = maxpool2d_3x3(x)
    out = jax.block_until_ready(out)

    # Reference check (pure JAX, same semantics as torch MaxPool2d(3)):
    ref = lax.reduce_window(
        x, -jnp.inf, lax.max,
        window_dimensions=(1, 1, KSIZE, KSIZE),
        window_strides=(1, 1, STRIDE, STRIDE),
        padding="VALID",
    )
    assert out.shape == (2, 4, 5, 5), out.shape
    assert jnp.allclose(out, ref), "mismatch vs reference max pool"

    print("KERNEL_OK")
</pallas_src>

<mosaic_0001>
module attributes {stable_mosaic.version = 11 : i64} {
  func.func @_maxpool3x3_kernel(%arg0: i32, %arg1: i32, %arg2: memref<8x16x16xf32, #tpu.memory_space<vmem>>, %arg3: memref<8x5x5xf32, #tpu.memory_space<vmem>>, %arg4: memref<8x5x16xf32, #tpu.memory_space<vmem>>, %arg5: memref<8x5x5xf32, #tpu.memory_space<vmem>>) attributes {dimension_semantics = [#tpu.dimension_semantics<parallel>, #tpu.dimension_semantics<parallel>], iteration_bounds = array<i64: 1, 1>, scalar_prefetch = 0 : i64, scratch_operands = 2 : i64, tpu.core_type = #tpu.core_type<tc>, window_params = [{transform_indices = @transform_0, window_bounds = array<i64: 8, 16, 16>}, {transform_indices = @transform_1, window_bounds = array<i64: 8, 5, 5>}]} {
    %c0 = arith.constant 0 : index
    %c0_0 = arith.constant 0 : index
    %c0_1 = arith.constant 0 : index
    %0 = vector.load %arg2[%c0, %c0_0, %c0_1] : memref<8x16x16xf32, #tpu.memory_space<vmem>>, vector<8x16x16xf32>
    %1 = vector.extract_strided_slice %0 {offsets = [0, 0, 0], sizes = [8, 1, 16], strides = [1, 1, 1]} : vector<8x16x16xf32> to vector<8x1x16xf32>
    %2 = vector.extract_strided_slice %0 {offsets = [0, 1, 0], sizes = [8, 1, 16], strides = [1, 1, 1]} : vector<8x16x16xf32> to vector<8x1x16xf32>
    %3 = arith.maximumf %1, %2 : vector<8x1x16xf32>
    %4 = vector.extract_strided_slice %0 {offsets = [0, 2, 0], sizes = [8, 1, 16], strides = [1, 1, 1]} : vector<8x16x16xf32> to vector<8x1x16xf32>
    %5 = arith.maximumf %3, %4 : vector<8x1x16xf32>
    %c0_2 = arith.constant 0 : index
    %c0_3 = arith.constant 0 : index
    %c0_4 = arith.constant 0 : index
    %6 = vector.load %arg4[%c0_2, %c0_3, %c0_4] : memref<8x5x16xf32, #tpu.memory_space<vmem>>, vector<8x1x16xf32>
    tpu.vector_store %arg4[%c0_2, %c0_3, %c0_4], %5 {strides = array<i32>} : memref<8x5x16xf32, #tpu.memory_space<vmem>>, vector<8x1x16xf32>,
    %7 = vector.extract_strided_slice %0 {offsets = [0, 3, 0], sizes = [8, 1, 16], strides = [1, 1, 1]} : vector<8x16x16xf32> to vector<8x1x16xf32>
    %8 = vector.extract_strided_slice %0 {offsets = [0, 4, 0], sizes = [8, 1, 16], strides = [1, 1, 1]} : vector<8x16x16xf32> to vector<8x1x16xf32>
    %9 = arith.maximumf %7, %8 : vector<8x1x16xf32>
    %10 = vector.extract_strided_slice %0 {offsets = [0, 5, 0], sizes = [8, 1, 16], strides = [1, 1, 1]} : vector<8x16x16xf32> to vector<8x1x16xf32>
    %11 = arith.maximumf %9, %10 : vector<8x1x16xf32>
    %c0_5 = arith.constant 0 : index
    %c1 = arith.constant 1 : index
    %c0_6 = arith.constant 0 : index
    %12 = vector.load %arg4[%c0_5, %c1, %c0_6] : memref<8x5x16xf32, #tpu.memory_space<vmem>>, vector<8x1x16xf32>
    tpu.vector_store %arg4[%c0_5, %c1, %c0_6], %11 {strides = array<i32>} : memref<8x5x16xf32, #tpu.memory_space<vmem>>, vector<8x1x16xf32>,
    %13 = vector.extract_strided_slice %0 {offsets = [0, 6, 0], sizes = [8, 1, 16], strides = [1, 1, 1]} : vector<8x16x16xf32> to vector<8x1x16xf32>
    %14 = vector.extract_strided_slice %0 {offsets = [0, 7, 0], sizes = [8, 1, 16], strides = [1, 1, 1]} : vector<8x16x16xf32> to vector<8x1x16xf32>
    %15 = arith.maximumf %13, %14 : vector<8x1x16xf32>
    %16 = vector.extract_strided_slice %0 {offsets = [0, 8, 0], sizes = [8, 1, 16], strides = [1, 1, 1]} : vector<8x16x16xf32> to vector<8x1x16xf32>
    %17 = arith.maximumf %15, %16 : vector<8x1x16xf32>
    %c0_7 = arith.constant 0 : index
    %c2 = arith.constant 2 : index
    %c0_8 = arith.constant 0 : index
    %18 = vector.load %arg4[%c0_7, %c2, %c0_8] : memref<8x5x16xf32, #tpu.memory_space<vmem>>, vector<8x1x16xf32>
    tpu.vector_store %arg4[%c0_7, %c2, %c0_8], %17 {strides = array<i32>} : memref<8x5x16xf32, #tpu.memory_space<vmem>>, vector<8x1x16xf32>,
    %19 = vector.extract_strided_slice %0 {offsets = [0, 9, 0], sizes = [8, 1, 16], strides = [1, 1, 1]} : vector<8x16x16xf32> to vector<8x1x16xf32>
    %20 = vector.extract_strided_slice %0 {offsets = [0, 10, 0], sizes = [8, 1, 16], strides = [1, 1, 1]} : vector<8x16x16xf32> to vector<8x1x16xf32>
    %21 = arith.maximumf %19, %20 : vector<8x1x16xf32>
    %22 = vector.extract_strided_slice %0 {offsets = [0, 11, 0], sizes = [8, 1, 16], strides = [1, 1, 1]} : vector<8x16x16xf32> to vector<8x1x16xf32>
    %23 = arith.maximumf %21, %22 : vector<8x1x16xf32>
    %c0_9 = arith.constant 0 : index
    %c3 = arith.constant 3 : index
    %c0_10 = arith.constant 0 : index
    %24 = vector.load %arg4[%c0_9, %c3, %c0_10] : memref<8x5x16xf32, #tpu.memory_space<vmem>>, vector<8x1x16xf32>
    tpu.vector_store %arg4[%c0_9, %c3, %c0_10], %23 {strides = array<i32>} : memref<8x5x16xf32, #tpu.memory_space<vmem>>, vector<8x1x16xf32>,
    %25 = vector.extract_strided_slice %0 {offsets = [0, 12, 0], sizes = [8, 1, 16], strides = [1, 1, 1]} : vector<8x16x16xf32> to vector<8x1x16xf32>
    %26 = vector.extract_strided_slice %0 {offsets = [0, 13, 0], sizes = [8, 1, 16], strides = [1, 1, 1]} : vector<8x16x16xf32> to vector<8x1x16xf32>
    %27 = arith.maximumf %25, %26 : vector<8x1x16xf32>
    %28 = vector.extract_strided_slice %0 {offsets = [0, 14, 0], sizes = [8, 1, 16], strides = [1, 1, 1]} : vector<8x16x16xf32> to vector<8x1x16xf32>
    %29 = arith.maximumf %27, %28 : vector<8x1x16xf32>
    %c0_11 = arith.constant 0 : index
    %c4 = arith.constant 4 : index
    %c0_12 = arith.constant 0 : index
    %30 = vector.load %arg4[%c0_11, %c4, %c0_12] : memref<8x5x16xf32, #tpu.memory_space<vmem>>, vector<8x1x16xf32>
    tpu.vector_store %arg4[%c0_11, %c4, %c0_12], %29 {strides = array<i32>} : memref<8x5x16xf32, #tpu.memory_space<vmem>>, vector<8x1x16xf32>,
    %c0_13 = arith.constant 0 : index
    %c0_14 = arith.constant 0 : index
    %c0_15 = arith.constant 0 : index
    %31 = vector.load %arg4[%c0_13, %c0_14, %c0_15] : memref<8x5x16xf32, #tpu.memory_space<vmem>>, vector<8x5x16xf32>
    %32 = vector.extract_strided_slice %31 {offsets = [0, 0, 0], sizes = [8, 5, 1], strides = [1, 1, 1]} : vector<8x5x16xf32> to vector<8x5x1xf32>
    %33 = vector.extract_strided_slice %31 {offsets = [0, 0, 1], sizes = [8, 5, 1], strides = [1, 1, 1]} : vector<8x5x16xf32> to vector<8x5x1xf32>
    %34 = arith.maximumf %32, %33 : vector<8x5x1xf32>
    %35 = vector.extract_strided_slice %31 {offsets = [0, 0, 2], sizes = [8, 5, 1], strides = [1, 1, 1]} : vector<8x5x16xf32> to vector<8x5x1xf32>
    %36 = arith.maximumf %34, %35 : vector<8x5x1xf32>
    %c0_16 = arith.constant 0 : index
    %c0_17 = arith.constant 0 : index
    %c0_18 = arith.constant 0 : index
    %37 = vector.load %arg5[%c0_16, %c0_17, %c0_18] : memref<8x5x5xf32, #tpu.memory_space<vmem>>, vector<8x5x1xf32>
    tpu.vector_store %arg5[%c0_16, %c0_17, %c0_18], %36 {strides = array<i32>} : memref<8x5x5xf32, #tpu.memory_space<vmem>>, vector<8x5x1xf32>,
    %38 = vector.extract_strided_slice %31 {offsets = [0, 0, 3], sizes = [8, 5, 1], strides = [1, 1, 1]} : vector<8x5x16xf32> to vector<8x5x1xf32>
    %39 = vector.extract_strided_slice %31 {offsets = [0, 0, 4], sizes = [8, 5, 1], strides = [1, 1, 1]} : vector<8x5x16xf32> to vector<8x5x1xf32>
    %40 = arith.maximumf %38, %39 : vector<8x5x1xf32>
    %41 = vector.extract_strided_slice %31 {offsets = [0, 0, 5], sizes = [8, 5, 1], strides = [1, 1, 1]} : vector<8x5x16xf32> to vector<8x5x1xf32>
    %42 = arith.maximumf %40, %41 : vector<8x5x1xf32>
    %c0_19 = arith.constant 0 : index
    %c0_20 = arith.constant 0 : index
    %c1_21 = arith.constant 1 : index
    %43 = vector.load %arg5[%c0_19, %c0_20, %c1_21] : memref<8x5x5xf32, #tpu.memory_space<vmem>>, vector<8x5x1xf32>
    tpu.vector_store %arg5[%c0_19, %c0_20, %c1_21], %42 {strides = array<i32>} : memref<8x5x5xf32, #tpu.memory_space<vmem>>, vector<8x5x1xf32>,
    %44 = vector.extract_strided_slice %31 {offsets = [0, 0, 6], sizes = [8, 5, 1], strides = [1, 1, 1]} : vector<8x5x16xf32> to vector<8x5x1xf32>
    %45 = vector.extract_strided_slice %31 {offsets = [0, 0, 7], sizes = [8, 5, 1], strides = [1, 1, 1]} : vector<8x5x16xf32> to vector<8x5x1xf32>
    %46 = arith.maximumf %44, %45 : vector<8x5x1xf32>
    %47 = vector.extract_strided_slice %31 {offsets = [0, 0, 8], sizes = [8, 5, 1], strides = [1, 1, 1]} : vector<8x5x16xf32> to vector<8x5x1xf32>
    %48 = arith.maximumf %46, %47 : vector<8x5x1xf32>
    %c0_22 = arith.constant 0 : index
    %c0_23 = arith.constant 0 : index
    %c2_24 = arith.constant 2 : index
    %49 = vector.load %arg5[%c0_22, %c0_23, %c2_24] : memref<8x5x5xf32, #tpu.memory_space<vmem>>, vector<8x5x1xf32>
    tpu.vector_store %arg5[%c0_22, %c0_23, %c2_24], %48 {strides = array<i32>} : memref<8x5x5xf32, #tpu.memory_space<vmem>>, vector<8x5x1xf32>,
    %50 = vector.extract_strided_slice %31 {offsets = [0, 0, 9], sizes = [8, 5, 1], strides = [1, 1, 1]} : vector<8x5x16xf32> to vector<8x5x1xf32>
    %51 = vector.extract_strided_slice %31 {offsets = [0, 0, 10], sizes = [8, 5, 1], strides = [1, 1, 1]} : vector<8x5x16xf32> to vector<8x5x1xf32>
    %52 = arith.maximumf %50, %51 : vector<8x5x1xf32>
    %53 = vector.extract_strided_slice %31 {offsets = [0, 0, 11], sizes = [8, 5, 1], strides = [1, 1, 1]} : vector<8x5x16xf32> to vector<8x5x1xf32>
    %54 = arith.maximumf %52, %53 : vector<8x5x1xf32>
    %c0_25 = arith.constant 0 : index
    %c0_26 = arith.constant 0 : index
    %c3_27 = arith.constant 3 : index
    %55 = vector.load %arg5[%c0_25, %c0_26, %c3_27] : memref<8x5x5xf32, #tpu.memory_space<vmem>>, vector<8x5x1xf32>
    tpu.vector_store %arg5[%c0_25, %c0_26, %c3_27], %54 {strides = array<i32>} : memref<8x5x5xf32, #tpu.memory_space<vmem>>, vector<8x5x1xf32>,
    %56 = vector.extract_strided_slice %31 {offsets = [0, 0, 12], sizes = [8, 5, 1], strides = [1, 1, 1]} : vector<8x5x16xf32> to vector<8x5x1xf32>
    %57 = vector.extract_strided_slice %31 {offsets = [0, 0, 13], sizes = [8, 5, 1], strides = [1, 1, 1]} : vector<8x5x16xf32> to vector<8x5x1xf32>
    %58 = arith.maximumf %56, %57 : vector<8x5x1xf32>
    %59 = vector.extract_strided_slice %31 {offsets = [0, 0, 14], sizes = [8, 5, 1], strides = [1, 1, 1]} : vector<8x5x16xf32> to vector<8x5x1xf32>
    %60 = arith.maximumf %58, %59 : vector<8x5x1xf32>
    %c0_28 = arith.constant 0 : index
    %c0_29 = arith.constant 0 : index
    %c4_30 = arith.constant 4 : index
    %61 = vector.load %arg5[%c0_28, %c0_29, %c4_30] : memref<8x5x5xf32, #tpu.memory_space<vmem>>, vector<8x5x1xf32>
    tpu.vector_store %arg5[%c0_28, %c0_29, %c4_30], %60 {strides = array<i32>} : memref<8x5x5xf32, #tpu.memory_space<vmem>>, vector<8x5x1xf32>,
    %c0_31 = arith.constant 0 : index
    %c0_32 = arith.constant 0 : index
    %c0_33 = arith.constant 0 : index
    %62 = vector.load %arg5[%c0_31, %c0_32, %c0_33] : memref<8x5x5xf32, #tpu.memory_space<vmem>>, vector<8x5x5xf32>
    %c0_34 = arith.constant 0 : index
    %c0_35 = arith.constant 0 : index
    %c0_36 = arith.constant 0 : index
    %63 = vector.load %arg3[%c0_34, %c0_35, %c0_36] : memref<8x5x5xf32, #tpu.memory_space<vmem>>, vector<8x5x5xf32>
    tpu.vector_store %arg3[%c0_34, %c0_35, %c0_36], %62 {strides = array<i32>} : memref<8x5x5xf32, #tpu.memory_space<vmem>>, vector<8x5x5xf32>,
    return
  }
  func.func @transform_0(%arg0: i32, %arg1: i32) -> (i32, i32, i32) {
    %c0_i32 = arith.constant 0 : i32
    %c0_i32_0 = arith.constant 0 : i32
    return %arg0, %arg1, %c0_i32 : i32, i32, i32
  }
  func.func @transform_1(%arg0: i32, %arg1: i32) -> (i32, i32, i32) {
    %c0_i32 = arith.constant 0 : i32
    %c0_i32_0 = arith.constant 0 : i32
    return %arg0, %arg1, %c0_i32 : i32, i32, i32
  }
}

</mosaic_0001>

<bundles_post_ra>
// kernel: tpu_custom_call.1
= control target key start
LH: loop header
LB: loop body
LE: loop exit
PB: predicated region body
PF: predicated region fallthrough
CT: control target
= control target key end

     0   :  { %6 = vsyncpa [#allocation5], 0  ;;  %s484_s6 = smov [#allocation4]   ;;  %s651_s0 = inlined_call_operand.hbm [shape: f32[8,16,16], index: 0, kind: input, shape index: {}]   ;;  %s652_s1 = inlined_call_operand.vmem [shape: f32[8,5,5], index: 1, kind: output, shape index: {}]  }
   0x1   :  { %s12_s7 = sshll.u32 %s484_s6, 4  ;;  %s13_s7 = int_to_ptr.vmem [resolvable:$true] %s12_s7 }
   0x2   :  { %s470_s8 = scalar_lea.vmem %s13_s7, 2048  ;;  %p475_p1 = scmp.lt.s32.totalorder %s13_s7, %s13_s7 }
   0x3   :  { %p471_p0 = scmp.ne.s32.totalorder %s13_s7, %s470_s8  ;;  %p476_p2 = scmp.lt.s32.totalorder %s470_s8, %s470_s8 }
   0x5   :  { %p477_p3 = por %p476_p2, %p475_p1 }
   0x7   :  { %p478_p4 = pnand %p477_p3, %p471_p0 }
   0x9   :  { %481 = shalt.err (!%p478_p4)
}
   0xa   :  { %s485_s9 = smov 128   ;;  %s486_s10 = smov 8  }
   0xb   :  { %18 = dma.hbm_to_vmem [thread:$0]  %s651_s0, 2048, %s13_s7, [#allocation5], %s485_s9, %s485_s9, %s486_s10  }
   0xc   :  { %482 = dma.done.wait [#allocation5], 2048  }
   0xd   :  { %483 = vsyncadd [#allocation5], 4294965248  ;;  %vm94_vm0 = vcmask 122880   ;;  %vm103_vm1 = vcmask 125955   ;;  %v26_v0 = vld [vmem:[#allocation4 + $0x20] sm:$0xff]  ;;  %v27_v1 = vld [vmem:[#allocation4 + $0x28] sm:$0xff] }
   0xe   :  { %vm144_vm2 = vcmask 129030   ;;  %vm185_vm3 = vcmask 123905   ;;  %vm194_vm4 = vcmask 126980   ;;  %v22_v2 = vld [vmem:[#allocation4] sm:$0xff]  ;;  %v48_v3 = vrot.slane %v26_v0, 1  ;;  %v23_v7 = vld [vmem:[#allocation4 + $0x8] sm:$0xff] }
   0xf   :  { %v72_v4 = vrot.slane %v26_v0, 2  ;;  %v122_v5 = vrot.slane %v27_v1, 2  ;;  %v155_v6 = vrot.slane %v27_v1, 1  ;;  %v28_v8 = vld [vmem:[#allocation4 + $0x30] sm:$0xff]  ;;  %v46_v9 = vrot.slane %v22_v2, 1  ;;  %v29_v13 = vld [vmem:[#allocation4 + $0x38] sm:$0xff] }
  0x10   :  { %v70_v10 = vrot.slane %v22_v2, 2  ;;  %v120_v11 = vrot.slane %v23_v7, 2  ;;  %v153_v12 = vrot.slane %v23_v7, 1  ;;  %v64_v14 = vmax.f32 %v26_v0, %v48_v3  ;;  %v24_v22 = vld [vmem:[#allocation4 + $0x10] sm:$0xff]  ;;  %v25_v27 = vld [vmem:[#allocation4 + $0x18] sm:$0xff]  ;;  %v30_v38 = vld [vmem:[#allocation4 + $0x40] sm:$0xff] }
  0x11   :  { %v171_v15 = vmax.f32 %v27_v1, %v155_v6  ;;  %v49_v16 = vrot.slane %v28_v8, 1  ;;  %v73_v17 = vrot.slane %v28_v8, 2  ;;  %v62_v18 = vmax.f32 %v22_v2, %v46_v9  ;;  %v32_v28 = vld [vmem:[#allocation4 + $0x50] sm:$0xff]  ;;  %v33_v33 = vld [vmem:[#allocation4 + $0x58] sm:$0xff]  ;;  %v31_v49 = vld [vmem:[#allocation4 + $0x48] sm:$0xff]  ;;  %s487_s0 = smov 127  }
  0x12   :  { %v169_v19 = vmax.f32 %v23_v7, %v153_v12  ;;  %v123_v20 = vrot.slane %v29_v13, 2  ;;  %v156_v21 = vrot.slane %v29_v13, 1  ;;  %v88_v23 = vmax.f32 %v64_v14, %v72_v4  ;;  %v36_v52 = vld [vmem:[#allocation4 + $0x70] sm:$0xff]  ;;  %v37_v57 = vld [vmem:[#allocation4 + $0x78] sm:$0xff]  ;;  %v34_v62 = vld [vmem:[#allocation4 + $0x60] sm:$0xff]  ;;  %s488_s13 = smov 126  }
  0x13   :  { %v138_v24 = vmax.f32 %v64_v14, %v122_v5  ;;  %v179_v25 = vmax.f32 %v171_v15, %v122_v5  ;;  %v65_v26 = vmax.f32 %v28_v8, %v49_v16  ;;  %v86_v29 = vmax.f32 %v62_v18, %v70_v10  ;;  %v35_v3 = vld [vmem:[#allocation4 + $0x68] sm:$0xff]  ;;  %s489_s14 = smov 124   ;;  %s490_s15 = smov 122  }
  0x14   :  { %v136_v30 = vmax.f32 %v62_v18, %v120_v11  ;;  %v177_v31 = vmax.f32 %v169_v19, %v120_v11  ;;  %v172_v32 = vmax.f32 %v29_v13, %v156_v21  ;;  %97 = vst.msk [vmem:[#allocation2 + $0x10] sm:$0x1] %vm94_vm0, %v88_v23  ;;  %v47_v36 = vrot.slane %v24_v22, 1  ;;  %s491_s16 = smov 120  }
  0x15   :  { %106 = vst.msk [vmem:[#allocation2 + $0xe] sm:$0x8] %vm103_vm1, %v88_v23  ;;  %v89_v34 = vmax.f32 %v65_v26, %v73_v17  ;;  %v139_v35 = vmax.f32 %v65_v26, %v123_v20  ;;  %v71_v37 = vrot.slane %v24_v22, 2  ;;  %104 = vst.msk [vmem:[#allocation2 - $0x2] sm:$0x8] %vm103_vm1, %v86_v29  ;;  %v121_v40 = vrot.slane %v25_v27, 2 }
  0x16   :  { %147 = vst.msk [vmem:[#allocation2 + $0xc] sm:$0x40] %vm144_vm2, %v138_v24  ;;  %145 = vst.msk [vmem:[#allocation2 - $0x4] sm:$0x40] %vm144_vm2, %v136_v30  ;;  %v180_v39 = vmax.f32 %v172_v32, %v123_v20  ;;  %v154_v41 = vrot.slane %v25_v27, 1  ;;  %v51_v42 = vrot.slane %v32_v28, 1  ;;  %v63_v43 = vmax.f32 %v24_v22, %v47_v36 }
  0x17   :  { %188 = vst.msk [vmem:[#allocation2 + $0x12] sm:$0x2] %vm185_vm3, %v179_v25  ;;  %186 = vst.msk [vmem:[#allocation2 + $0x2] sm:$0x2] %vm185_vm3, %v177_v31  ;;  %v75_v44 = vrot.slane %v32_v28, 2  ;;  %v125_v45 = vrot.slane %v33_v33, 2 }
  0x18   :  { %197 = vst.msk [vmem:[#allocation2 + $0x10] sm:$0x10] %vm194_vm4, %v179_v25  ;;  %195 = vst.msk [vmem:[#allocation2] sm:$0x10] %vm194_vm4, %v177_v31  ;;  %v158_v46 = vrot.slane %v33_v33, 1  ;;  %v170_v47 = vmax.f32 %v25_v27, %v154_v41  ;;  %v67_v48 = vmax.f32 %v32_v28, %v51_v42  ;;  %v50_v50 = vrot.slane %v30_v38, 1 }
  0x19   :  { %95 = vst.msk [vmem:[#allocation2] sm:$0x1] %vm94_vm0, %v86_v29  ;;  %98 = vst.msk [vmem:[#allocation2 + $0x18] sm:$0x1] %vm94_vm0, %v89_v34  ;;  %v74_v51 = vrot.slane %v30_v38, 2  ;;  %v87_v53 = vmax.f32 %v63_v43, %v71_v37  ;;  %v137_v54 = vmax.f32 %v63_v43, %v121_v40  ;;  %v124_v56 = vrot.slane %v31_v49, 2 }
  0x1a   :  { %107 = vst.msk [vmem:[#allocation2 + $0x16] sm:$0x8] %vm103_vm1, %v89_v34  ;;  %v174_v55 = vmax.f32 %v33_v33, %v158_v46  ;;  %v178_v58 = vmax.f32 %v170_v47, %v121_v40  ;;  %v91_v59 = vmax.f32 %v67_v48, %v75_v44  ;;  %v141_v60 = vmax.f32 %v67_v48, %v125_v45 }
  0x1b   :  { %148 = vst.msk [vmem:[#allocation2 + $0x14] sm:$0x40] %vm144_vm2, %v139_v35  ;;  %v66_v61 = vmax.f32 %v30_v38, %v50_v50  ;;  %146 = vst.msk [vmem:[#allocation2 + $0x4] sm:$0x40] %vm144_vm2, %v137_v54  ;;  %v157_v0 = vrot.slane %v31_v49, 1  ;;  %v53_v1 = vrot.slane %v36_v52, 1 }
  0x1c   :  { %189 = vst.msk [vmem:[#allocation2 + $0x1a] sm:$0x2] %vm185_vm3, %v180_v39  ;;  %v182_v63 = vmax.f32 %v174_v55, %v125_v45  ;;  %v77_v2 = vrot.slane %v36_v52, 2  ;;  %187 = vst.msk [vmem:[#allocation2 + $0xa] sm:$0x2] %vm185_vm3, %v178_v58  ;;  %v127_v7 = vrot.slane %v37_v57, 2 }
  0x1d   :  { %198 = vst.msk [vmem:[#allocation2 + $0x18] sm:$0x10] %vm194_vm4, %v180_v39  ;;  %196 = vst.msk [vmem:[#allocation2 + $0x8] sm:$0x10] %vm194_vm4, %v178_v58  ;;  %v90_v5 = vmax.f32 %v66_v61, %v74_v51  ;;  %v140_v6 = vmax.f32 %v66_v61, %v124_v56  ;;  %v160_v8 = vrot.slane %v37_v57, 1  ;;  %v173_v10 = vmax.f32 %v31_v49, %v157_v0 }
  0x1e   :  { %96 = vst.msk [vmem:[#allocation2 + $0x8] sm:$0x1] %vm94_vm0, %v87_v53  ;;  %100 = vst.msk [vmem:[#allocation2 + $0x28] sm:$0x1] %vm94_vm0, %v91_v59  ;;  %v69_v11 = vmax.f32 %v36_v52, %v53_v1  ;;  %v52_v12 = vrot.slane %v34_v62, 1  ;;  %v76_v13 = vrot.slane %v34_v62, 2 }
  0x1f   :  { %105 = vst.msk [vmem:[#allocation2 + $0x6] sm:$0x8] %vm103_vm1, %v87_v53  ;;  %v523_v4 = vld [vmem:[#allocation2 + $0x10] sm:$0x1f]  ;;  %109 = vst.msk [vmem:[#allocation2 + $0x26] sm:$0x8] %vm103_vm1, %v91_v59  ;;  %v176_v14 = vmax.f32 %v37_v57, %v160_v8  ;;  %v181_v18 = vmax.f32 %v173_v10, %v124_v56 }
  0x20   :  { %150 = vst.msk [vmem:[#allocation2 + $0x24] sm:$0x40] %vm144_vm2, %v141_v60  ;;  %223 = vrot.lane.b32.xlu1 %v523_v4, %s487_s0  ;;  %v532_v9 = vld [vmem:[#allocation2] sm:$0x1f]  ;;  %149 = vst.msk [vmem:[#allocation2 + $0x1c] sm:$0x40] %vm144_vm2, %v140_v6  ;;  %v93_v19 = vmax.f32 %v69_v11, %v77_v2  ;;  %v143_v20 = vmax.f32 %v69_v11, %v127_v7  ;;  %v68_v21 = vmax.f32 %v34_v62, %v52_v12 }
  0x21   :  { %191 = vst.msk [vmem:[#allocation2 + $0x2a] sm:$0x2] %vm185_vm3, %v182_v63  ;;  %219 = vrot.lane.b32.xlu0 %v532_v9, %s487_s0  ;;  %v126_v15 = vrot.slane %v35_v3, 2  ;;  %v159_v16 = vrot.slane %v35_v3, 1  ;;  %v184_v22 = vmax.f32 %v176_v14, %v127_v7  ;;  %190 = vst.msk [vmem:[#allocation2 + $0x22] sm:$0x2] %vm185_vm3, %v181_v18 }
  0x22   :  { %200 = vst.msk [vmem:[#allocation2 + $0x28] sm:$0x10] %vm194_vm4, %v182_v63  ;;  %199 = vst.msk [vmem:[#allocation2 + $0x20] sm:$0x10] %vm194_vm4, %v181_v18  ;;  %v92_v24 = vmax.f32 %v68_v21, %v76_v13  ;;  %vm283_vm5 = vcmask 4096   ;;  %vm324_vm6 = vcmask 12296  }
  0x23   :  { %99 = vst.msk [vmem:[#allocation2 + $0x20] sm:$0x1] %vm94_vm0, %v90_v5  ;;  %v175_v23 = vmax.f32 %v35_v3, %v159_v16  ;;  %102 = vst.msk [vmem:[#allocation2 + $0x38] sm:$0x1] %vm94_vm0, %v93_v19  ;;  %v142_v25 = vmax.f32 %v68_v21, %v126_v15  ;;  %vm357_vm7 = vcmask 20496   ;;  %vm390_vm8 = vcmask 28696  }
  0x24   :  { %108 = vst.msk [vmem:[#allocation2 + $0x1e] sm:$0x8] %vm103_vm1, %v90_v5  ;;  %v206_v17 = vld [vmem:[#allocation2 + $0x18] sm:$0x1f]  ;;  %111 = vst.msk [vmem:[#allocation2 + $0x36] sm:$0x8] %vm103_vm1, %v93_v19 }
  0x25   :  { %225 = vrot.lane.b32.xlu1 %v206_v17, %s487_s0  ;;  %152 = vst.msk [vmem:[#allocation2 + $0x34] sm:$0x40] %vm144_vm2, %v143_v20  ;;  %v183_v26 = vmax.f32 %v175_v23, %v126_v15  ;;  %151 = vst.msk [vmem:[#allocation2 + $0x2c] sm:$0x40] %vm144_vm2, %v142_v25  ;;  %vm423_vm9 = vcmask 36896   ;;  %vm440_vm10 = vcmask 36864  }
  0x26   :  { %193 = vst.msk [vmem:[#allocation2 + $0x3a] sm:$0x2] %vm185_vm3, %v184_v22  ;;  %v204_v27 = vld [vmem:[#allocation2 + $0x8] sm:$0x1f] }
  0x27   :  { %202 = vst.msk [vmem:[#allocation2 + $0x38] sm:$0x10] %vm194_vm4, %v184_v22  ;;  %221 = vrot.lane.b32.xlu0 %v204_v27, %s487_s0  ;;  %201 = vst.msk [vmem:[#allocation2 + $0x30] sm:$0x10] %vm194_vm4, %v183_v26 }
  0x28   :  { %101 = vst.msk [vmem:[#allocation2 + $0x30] sm:$0x1] %vm94_vm0, %v92_v24 }
  0x29   :  { %110 = vst.msk [vmem:[#allocation2 + $0x2e] sm:$0x8] %vm103_vm1, %v92_v24  ;;  %v208_v28 = vld [vmem:[#allocation2 + $0x28] sm:$0x1f] }
  0x2a   :  { %192 = vst.msk [vmem:[#allocation2 + $0x32] sm:$0x2] %vm185_vm3, %v183_v26  ;;  %229 = vrot.lane.b32.xlu1 %v208_v28, %s487_s0 }
  0x2b   :  { %v207_v29 = vld [vmem:[#allocation2 + $0x20] sm:$0x1f] }
  0x2c   :  { %227 = vrot.lane.b32.xlu0 %v207_v29, %s487_s0 }
  0x2e   :  { %v210_v30 = vld [vmem:[#allocation2 + $0x38] sm:$0x1f] }
  0x2f   :  { %233 = vrot.lane.b32.xlu1 %v210_v30, %s487_s0 }
  0x31   :  { %v209_v31 = vld [vmem:[#allocation2 + $0x30] sm:$0x1f] }
  0x32   :  { %231 = vrot.lane.b32.xlu0 %v209_v31, %s487_s0 }
  0x33   :  { %253 = vrot.lane.b32.xlu1 %v204_v27, %s488_s13 }
  0x36   :  { %251 = vrot.lane.b32.xlu0 %v532_v9, %s488_s13 }
  0x37   :  { %257 = vrot.lane.b32.xlu1 %v206_v17, %s488_s13 }
  0x3a   :  { %255 = vrot.lane.b32.xlu0 %v523_v4, %s488_s13 }
  0x3b   :  { %261 = vrot.lane.b32.xlu1 %v208_v28, %s488_s13 }
  0x3e   :  { %259 = vrot.lane.b32.xlu0 %v207_v29, %s488_s13 }
  0x3f   :  { %265 = vrot.lane.b32.xlu1 %v210_v30, %s488_s13 }
  0x42   :  { %263 = vrot.lane.b32.xlu0 %v209_v31, %s488_s13 }
  0x92   :  { %v224_v32 = vpop.permute.xlu1 %223 }
  0x93   :  { %v220_v33 = vpop.permute.xlu0 %219  ;;  %v245_v49 = vmax.f32 %v523_v4, %v224_v32 }
  0x94   :  { %v243_v43 = vmax.f32 %v532_v9, %v220_v33 }
  0x97   :  { %v226_v34 = vpop.permute.xlu1 %225 }
  0x98   :  { %v246_v44 = vmax.f32 %v206_v17, %v226_v34 }
  0x99   :  { %v222_v35 = vpop.permute.xlu0 %221 }
  0x9a   :  { %v244_v39 = vmax.f32 %v204_v27, %v222_v35 }
  0x9c   :  { %v230_v36 = vpop.permute.xlu1 %229 }
  0x9d   :  { %v248_v50 = vmax.f32 %v208_v28, %v230_v36 }
  0x9e   :  { %v228_v37 = vpop.permute.xlu0 %227 }
  0x9f   :  { %v247_v55 = vmax.f32 %v207_v29, %v228_v37 }
  0xa1   :  { %v234_v38 = vpop.permute.xlu1 %233 }
  0xa2   :  { %v250_v56 = vmax.f32 %v210_v30, %v234_v38 }
  0xa4   :  { %v232_v40 = vpop.permute.xlu0 %231 }
  0xa5   :  { %v254_v41 = vpop.permute.xlu1 %253  ;;  %v249_v61 = vmax.f32 %v209_v31, %v232_v40 }
  0xa6   :  { %v276_v42 = vmax.f32 %v244_v39, %v254_v41 }
  0xa8   :  { %v252_v45 = vpop.permute.xlu0 %251  ;;  %302 = vrot.lane.b32.xlu1 %v276_v42, %s488_s13  ;;  %285 = vst.msk [vmem:[#allocation3 + $0x8] sm:$0x1f] %vm283_vm5, %v276_v42 }
  0xa9   :  { %v275_v46 = vmax.f32 %v243_v43, %v252_v45  ;;  %v258_v47 = vpop.permute.xlu1 %257 }
  0xaa   :  { %v278_v48 = vmax.f32 %v246_v44, %v258_v47 }
  0xab   :  { %300 = vrot.lane.b32.xlu0 %v275_v46, %s488_s13  ;;  %284 = vst.msk [vmem:[#allocation3] sm:$0x1f] %vm283_vm5, %v275_v46 }
  0xac   :  { %v256_v51 = vpop.permute.xlu0 %255  ;;  %306 = vrot.lane.b32.xlu1 %v278_v48, %s488_s13  ;;  %287 = vst.msk [vmem:[#allocation3 + $0x18] sm:$0x1f] %vm283_vm5, %v278_v48 }
  0xad   :  { %v277_v52 = vmax.f32 %v245_v49, %v256_v51  ;;  %v262_v53 = vpop.permute.xlu1 %261 }
  0xae   :  { %v280_v54 = vmax.f32 %v248_v50, %v262_v53 }
  0xaf   :  { %304 = vrot.lane.b32.xlu0 %v277_v52, %s488_s13  ;;  %286 = vst.msk [vmem:[#allocation3 + $0x10] sm:$0x1f] %vm283_vm5, %v277_v52 }
  0xb0   :  { %v260_v57 = vpop.permute.xlu0 %259  ;;  %310 = vrot.lane.b32.xlu1 %v280_v54, %s488_s13  ;;  %289 = vst.msk [vmem:[#allocation3 + $0x28] sm:$0x1f] %vm283_vm5, %v280_v54 }
  0xb1   :  { %v279_v58 = vmax.f32 %v247_v55, %v260_v57  ;;  %v266_v59 = vpop.permute.xlu1 %265 }
  0xb2   :  { %v282_v60 = vmax.f32 %v250_v56, %v266_v59 }
  0xb3   :  { %308 = vrot.lane.b32.xlu0 %v279_v58, %s488_s13  ;;  %288 = vst.msk [vmem:[#allocation3 + $0x20] sm:$0x1f] %vm283_vm5, %v279_v58 }
  0xb4   :  { %v264_v62 = vpop.permute.xlu0 %263  ;;  %314 = vrot.lane.b32.xlu1 %v282_v60, %s488_s13  ;;  %291 = vst.msk [vmem:[#allocation3 + $0x38] sm:$0x1f] %vm283_vm5, %v282_v60 }
  0xb5   :  { %v281_v63 = vmax.f32 %v249_v61, %v264_v62 }
  0xb7   :  { %312 = vrot.lane.b32.xlu0 %v281_v63, %s488_s13  ;;  %290 = vst.msk [vmem:[#allocation3 + $0x30] sm:$0x1f] %vm283_vm5, %v281_v63 }
  0xb8   :  { %335 = vrot.lane.b32.xlu1 %v276_v42, %s489_s14 }
  0xbb   :  { %333 = vrot.lane.b32.xlu0 %v275_v46, %s489_s14 }
  0xbc   :  { %339 = vrot.lane.b32.xlu1 %v278_v48, %s489_s14 }
  0xbf   :  { %337 = vrot.lane.b32.xlu0 %v277_v52, %s489_s14 }
  0xc0   :  { %343 = vrot.lane.b32.xlu1 %v280_v54, %s489_s14 }
  0xc3   :  { %341 = vrot.lane.b32.xlu0 %v279_v58, %s489_s14 }
  0xc4   :  { %347 = vrot.lane.b32.xlu1 %v282_v60, %s489_s14 }
  0xc7   :  { %345 = vrot.lane.b32.xlu0 %v281_v63, %s489_s14 }
  0xc8   :  { %368 = vrot.lane.b32.xlu1 %v276_v42, %s490_s15 }
  0xcb   :  { %366 = vrot.lane.b32.xlu0 %v275_v46, %s490_s15 }
  0xcc   :  { %372 = vrot.lane.b32.xlu1 %v278_v48, %s490_s15 }
  0xcf   :  { %370 = vrot.lane.b32.xlu0 %v277_v52, %s490_s15 }
  0xd0   :  { %376 = vrot.lane.b32.xlu1 %v280_v54, %s490_s15 }
  0xd3   :  { %374 = vrot.lane.b32.xlu0 %v279_v58, %s490_s15 }
  0xd4   :  { %380 = vrot.lane.b32.xlu1 %v282_v60, %s490_s15 }
  0xd7   :  { %378 = vrot.lane.b32.xlu0 %v281_v63, %s490_s15 }
  0xd8   :  { %401 = vrot.lane.b32.xlu1 %v276_v42, %s491_s16 }
  0xdb   :  { %399 = vrot.lane.b32.xlu0 %v275_v46, %s491_s16 }
  0xdc   :  { %405 = vrot.lane.b32.xlu1 %v278_v48, %s491_s16 }
  0xdf   :  { %403 = vrot.lane.b32.xlu0 %v277_v52, %s491_s16 }
  0xe0   :  { %409 = vrot.lane.b32.xlu1 %v280_v54, %s491_s16 }
  0xe3   :  { %407 = vrot.lane.b32.xlu0 %v279_v58, %s491_s16 }
  0xe4   :  { %413 = vrot.lane.b32.xlu1 %v282_v60, %s491_s16 }
  0xe7   :  { %411 = vrot.lane.b32.xlu0 %v281_v63, %s491_s16 }
 0x11a   :  { %v303_v0 = vpop.permute.xlu1 %302 }
 0x11b   :  { %326 = vst.msk [vmem:[#allocation3 + $0x8] sm:$0x1f] %vm324_vm6, %v303_v0 }
 0x11d   :  { %v301_v1 = vpop.permute.xlu0 %300 }
 0x11e   :  { %325 = vst.msk [vmem:[#allocation3] sm:$0x1f] %vm324_vm6, %v301_v1  ;;  %v307_v2 = vpop.permute.xlu1 %306 }
 0x11f   :  { %328 = vst.msk [vmem:[#allocation3 + $0x18] sm:$0x1f] %vm324_vm6, %v307_v2 }
 0x121   :  { %v305_v3 = vpop.permute.xlu0 %304 }
 0x122   :  { %327 = vst.msk [vmem:[#allocation3 + $0x10] sm:$0x1f] %vm324_vm6, %v305_v3  ;;  %v311_v4 = vpop.permute.xlu1 %310 }
 0x123   :  { %330 = vst.msk [vmem:[#allocation3 + $0x28] sm:$0x1f] %vm324_vm6, %v311_v4 }
 0x125   :  { %v309_v5 = vpop.permute.xlu0 %308 }
 0x126   :  { %329 = vst.msk [vmem:[#allocation3 + $0x20] sm:$0x1f] %vm324_vm6, %v309_v5  ;;  %v315_v6 = vpop.permute.xlu1 %314 }
 0x127   :  { %332 = vst.msk [vmem:[#allocation3 + $0x38] sm:$0x1f] %vm324_vm6, %v315_v6 }
 0x129   :  { %v313_v7 = vpop.permute.xlu0 %312 }
 0x12a   :  { %331 = vst.msk [vmem:[#allocation3 + $0x30] sm:$0x1f] %vm324_vm6, %v313_v7  ;;  %v336_v8 = vpop.permute.xlu1 %335 }
 0x12b   :  { %359 = vst.msk [vmem:[#allocation3 + $0x8] sm:$0x1f] %vm357_vm7, %v336_v8 }
 0x12d   :  { %v334_v9 = vpop.permute.xlu0 %333 }
 0x12e   :  { %358 = vst.msk [vmem:[#allocation3] sm:$0x1f] %vm357_vm7, %v334_v9  ;;  %v340_v10 = vpop.permute.xlu1 %339 }
 0x12f   :  { %361 = vst.msk [vmem:[#allocation3 + $0x18] sm:$0x1f] %vm357_vm7, %v340_v10 }
 0x131   :  { %v338_v11 = vpop.permute.xlu0 %337 }
 0x132   :  { %360 = vst.msk [vmem:[#allocation3 + $0x10] sm:$0x1f] %vm357_vm7, %v338_v11  ;;  %v344_v12 = vpop.permute.xlu1 %343 }
 0x133   :  { %363 = vst.msk [vmem:[#allocation3 + $0x28] sm:$0x1f] %vm357_vm7, %v344_v12 }
 0x135   :  { %v342_v13 = vpop.permute.xlu0 %341 }
 0x136   :  { %362 = vst.msk [vmem:[#allocation3 + $0x20] sm:$0x1f] %vm357_vm7, %v342_v13  ;;  %v348_v14 = vpop.permute.xlu1 %347 }
 0x137   :  { %365 = vst.msk [vmem:[#allocation3 + $0x38] sm:$0x1f] %vm357_vm7, %v348_v14 }
 0x139   :  { %v346_v15 = vpop.permute.xlu0 %345 }
 0x13a   :  { %364 = vst.msk [vmem:[#allocation3 + $0x30] sm:$0x1f] %vm357_vm7, %v346_v15  ;;  %v369_v16 = vpop.permute.xlu1 %368 }
 0x13b   :  { %392 = vst.msk [vmem:[#allocation3 + $0x8] sm:$0x1f] %vm390_vm8, %v369_v16 }
 0x13d   :  { %v367_v17 = vpop.permute.xlu0 %366 }
 0x13e   :  { %391 = vst.msk [vmem:[#allocation3] sm:$0x1f] %vm390_vm8, %v367_v17  ;;  %v373_v18 = vpop.permute.xlu1 %372 }
 0x13f   :  { %394 = vst.msk [vmem:[#allocation3 + $0x18] sm:$0x1f] %vm390_vm8, %v373_v18 }
 0x141   :  { %v371_v19 = vpop.permute.xlu0 %370 }
 0x142   :  { %393 = vst.msk [vmem:[#allocation3 + $0x10] sm:$0x1f] %vm390_vm8, %v371_v19  ;;  %v377_v20 = vpop.permute.xlu1 %376 }
 0x143   :  { %396 = vst.msk [vmem:[#allocation3 + $0x28] sm:$0x1f] %vm390_vm8, %v377_v20 }
 0x145   :  { %v375_v21 = vpop.permute.xlu0 %374 }
 0x146   :  { %395 = vst.msk [vmem:[#allocation3 + $0x20] sm:$0x1f] %vm390_vm8, %v375_v21  ;;  %v381_v22 = vpop.permute.xlu1 %380 }
 0x147   :  { %398 = vst.msk [vmem:[#allocation3 + $0x38] sm:$0x1f] %vm390_vm8, %v381_v22 }
 0x149   :  { %v379_v23 = vpop.permute.xlu0 %378 }
 0x14a   :  { %397 = vst.msk [vmem:[#allocation3 + $0x30] sm:$0x1f] %vm390_vm8, %v379_v23  ;;  %v402_v24 = vpop.permute.xlu1 %401 }
 0x14b   :  { %425 = vst.msk [vmem:[#allocation3 + $0x8] sm:$0x1f] %vm423_vm9, %v402_v24 }
 0x14d   :  { %v400_v25 = vpop.permute.xlu0 %399 }
 0x14e   :  { %424 = vst.msk [vmem:[#allocation3] sm:$0x1f] %vm423_vm9, %v400_v25  ;;  %v406_v26 = vpop.permute.xlu1 %405 }
 0x14f   :  { %427 = vst.msk [vmem:[#allocation3 + $0x18] sm:$0x1f] %vm423_vm9, %v406_v26 }
 0x151   :  { %v404_v27 = vpop.permute.xlu0 %403 }
 0x152   :  { %v433_v28 = vld [vmem:[#allocation3 + $0x8] sm:$0x1f]  ;;  %426 = vst.msk [vmem:[#allocation3 + $0x10] sm:$0x1f] %vm423_vm9, %v404_v27  ;;  %v410_v29 = vpop.permute.xlu1 %409 }
 0x153   :  { %442 = vst.msk [vmem:[%s652_s1 + $0x8] sm:$0x1f] %vm440_vm10, %v433_v28 }
 0x154   :  { %429 = vst.msk [vmem:[#allocation3 + $0x28] sm:$0x1f] %vm423_vm9, %v410_v29 }
 0x155   :  { %v432_v30 = vld [vmem:[#allocation3] sm:$0x1f]  ;;  %v408_v31 = vpop.permute.xlu0 %407 }
 0x156   :  { %441 = vst.msk [vmem:[%s652_s1] sm:$0x1f] %vm440_vm10, %v432_v30  ;;  %v435_v32 = vld [vmem:[#allocation3 + $0x18] sm:$0x1f]  ;;  %v414_v33 = vpop.permute.xlu1 %413 }
 0x157   :  { %428 = vst.msk [vmem:[#allocation3 + $0x20] sm:$0x1f] %vm423_vm9, %v408_v31  ;;  %431 = vst.msk [vmem:[#allocation3 + $0x38] sm:$0x1f] %vm423_vm9, %v414_v33 }
 0x158   :  { %444 = vst.msk [vmem:[%s652_s1 + $0x18] sm:$0x1f] %vm440_vm10, %v435_v32 }
 0x159   :  { %v434_v34 = vld [vmem:[#allocation3 + $0x10] sm:$0x1f]  ;;  %v412_v35 = vpop.permute.xlu0 %411 }
 0x15a   :  { %443 = vst.msk [vmem:[%s652_s1 + $0x10] sm:$0x1f] %vm440_vm10, %v434_v34 }
 0x15b   :  { %v437_v36 = vld [vmem:[#allocation3 + $0x28] sm:$0x1f]  ;;  %430 = vst.msk [vmem:[#allocation3 + $0x30] sm:$0x1f] %vm423_vm9, %v412_v35 }
 0x15c   :  { %446 = vst.msk [vmem:[%s652_s1 + $0x28] sm:$0x1f] %vm440_vm10, %v437_v36 }
 0x15e   :  { %v436_v37 = vld [vmem:[#allocation3 + $0x20] sm:$0x1f]  ;;  %v439_v38 = vld [vmem:[#allocation3 + $0x38] sm:$0x1f] }
 0x15f   :  { %445 = vst.msk [vmem:[%s652_s1 + $0x20] sm:$0x1f] %vm440_vm10, %v436_v37  ;;  %448 = vst.msk [vmem:[%s652_s1 + $0x38] sm:$0x1f] %vm440_vm10, %v439_v38 }
 0x162   :  { %v438_v39 = vld [vmem:[#allocation3 + $0x30] sm:$0x1f] }
 0x163   :  { %447 = vst.msk [vmem:[%s652_s1 + $0x30] sm:$0x1f] %vm440_vm10, %v438_v39 }
 0x164   :  { %453 = vsyncpa [#allocation5], 1 }

</bundles_post_ra>
